<compile_context>
chip_gen: v7x
topology: tpu7x:2x2x1
jax: 0.10.0
libtpu: 0.0.40
codegen_flags: <defaults>
</compile_context>

<pallas_src>
import jax
import jax.numpy as jnp
from jax.experimental import pallas as pl
from jax.experimental.pallas import tpu as pltpu


def _round_up(x: int, m: int) -> int:
    return ((x + m - 1) // m) * m


def _sampler_kernel(od_ref, w_ref, pts_ref):
    # od_ref : (TN, 8)  rows = [ox, oy, oz, dx, dy, dz, 0, 0]
    # w_ref  : (8, 3P)  selection / z matrix (constant block, resident)
    # pts_ref: (TN, 3P) interleaved sample points, lane-dense stores
    pts_ref[...] = jnp.dot(
        od_ref[...], w_ref[...],
        preferred_element_type=jnp.float32,
        precision=jax.lax.Precision.HIGHEST)


def stratified_raysampler(origins, directions, *, n_pts_per_ray, min_depth,
                          max_depth, tile_n=512):
    """Returns (sample_points (N, P, 3), sample_lengths (N*P, 1))."""
    N, C = origins.shape
    assert C == 3 and directions.shape == (N, 3)
    P = int(n_pts_per_ray)
    L = 3 * P

    # z values: same jnp.linspace the reference uses (torch.linspace semantics).
    z = jnp.linspace(min_depth, max_depth, P, dtype=jnp.float32)          # (P,)

    # ---- build the (8, 3P) selection matrix W (tiny, wrapper-side XLA) -----
    #   W[c,   3p+cc] = (c == cc)
    #   W[3+c, 3p+cc] = (c == cc) * z[p]
    #   rows 6,7 are zero padding so K is sublane-aligned (8).
    sel = jnp.tile(jnp.eye(3, dtype=jnp.float32), (1, P))                  # (3, 3P)
    z_rep = jnp.repeat(z, 3)                                               # (3P,)
    w = jnp.concatenate(
        [sel, sel * z_rep[None, :], jnp.zeros((2, L), jnp.float32)], axis=0)  # (8, 3P)

    # ---- pack ray inputs: [origins | directions | 0 0]  (rays on sublanes) --
    od = jnp.concatenate(
        [origins.astype(jnp.float32), directions.astype(jnp.float32),
         jnp.zeros((N, 2), jnp.float32)], axis=1)                          # (N, 8)

    # Tile size: multiple of 8 rays, capped so one output block stays ~4 MiB
    # (fits v7x's smaller VMEM comfortably even double-buffered).
    max_rows_vmem = max(8, (4 * 1024 * 1024) // (L * 4) // 8 * 8)
    tn = max(8, min(int(tile_n), _round_up(N, 8), max_rows_vmem))
    tn = _round_up(tn, 8)
    n_pad = _round_up(N, tn)
    if n_pad != N:
        od = jnp.pad(od, ((0, n_pad - N), (0, 0)))

    pts_flat = pl.pallas_call(
        _sampler_kernel,
        out_shape=jax.ShapeDtypeStruct((n_pad, L), jnp.float32),
        grid_spec=pltpu.PrefetchScalarGridSpec(
            num_scalar_prefetch=0,
            grid=(n_pad // tn,),
            in_specs=[
                pl.BlockSpec((tn, 8), lambda i: (i, 0)),
                pl.BlockSpec((8, L), lambda i: (0, 0)),
            ],
            out_specs=pl.BlockSpec((tn, L), lambda i: (i, 0)),
        ),
        compiler_params=pltpu.CompilerParams(
            dimension_semantics=("parallel",)),
    )(od, w)

    # Free reshape: (N, 3P) row-major == (N, P, 3) row-major (no transpose).
    sample_points = pts_flat[:N].reshape(N, P, 3)
    # sample_lengths is redundant per-ray data -> produced in the wrapper.
    sample_lengths = jnp.broadcast_to(z.reshape(1, P, 1), (N, P, 1)).reshape(-1, 1)
    # TODO(synk): ray_bundle._replace(...) namedtuple plumbing is left to the caller.
    return sample_points, sample_lengths


def _reference(origins, directions, n_pts_per_ray, min_depth, max_depth):
    z = jnp.linspace(min_depth, max_depth, n_pts_per_ray, dtype=jnp.float32)
    sample_lengths = jnp.broadcast_to(z.reshape(1, -1, 1),
                                      (origins.shape[0], n_pts_per_ray, 1))
    sample_points = (origins[:, None, :]
                     + directions[:, None, :] * sample_lengths)
    return sample_points, sample_lengths.reshape(-1, 1)


if __name__ == "__main__":
    # cfg (deterministic, in-script): n_pts_per_ray=64, min_depth=0.1, max_depth=4.0
    N_RAYS = 16
    N_PTS = 64
    MIN_DEPTH = 0.1
    MAX_DEPTH = 4.0

    key = jax.random.PRNGKey(0)
    k_o, k_d = jax.random.split(key)
    origins = jax.random.normal(k_o, (N_RAYS, 3), dtype=jnp.float32)
    directions = jax.random.normal(k_d, (N_RAYS, 3), dtype=jnp.float32)
    directions = directions / jnp.linalg.norm(directions, axis=-1, keepdims=True)

    pts, lens = stratified_raysampler(
        origins, directions,
        n_pts_per_ray=N_PTS, min_depth=MIN_DEPTH, max_depth=MAX_DEPTH)
    jax.block_until_ready(pts)
    jax.block_until_ready(lens)

    ref_pts, ref_lens = _reference(origins, directions, N_PTS, MIN_DEPTH, MAX_DEPTH)
    assert pts.shape == (N_RAYS, N_PTS, 3)
    assert lens.shape == (N_RAYS * N_PTS, 1)
    assert jnp.allclose(pts, ref_pts, atol=1e-5, rtol=1e-5)
    assert jnp.allclose(lens, ref_lens, atol=1e-5, rtol=1e-5)

    print("KERNEL_OK")
</pallas_src>

<mosaic_0001>
module attributes {stable_mosaic.version = 11 : i64} {
  func.func @_sampler_kernel(%arg0: i32, %arg1: memref<16x8xf32, #tpu.memory_space<vmem>>, %arg2: memref<8x192xf32, #tpu.memory_space<vmem>>, %arg3: memref<16x192xf32, #tpu.memory_space<vmem>>) attributes {dimension_semantics = [#tpu.dimension_semantics<parallel>], iteration_bounds = array<i64: 1>, scalar_prefetch = 0 : i64, scratch_operands = 0 : i64, tpu.core_type = #tpu.core_type<tc>, window_params = [{transform_indices = @transform_0, window_bounds = array<i64: 16, 8>}, {pipeline_mode = #tpu.pipeline_mode<synchronous>, transform_indices = @transform_1, window_bounds = array<i64: 8, 192>}, {transform_indices = @transform_2, window_bounds = array<i64: 16, 192>}]} {
    %c0 = arith.constant 0 : index
    %c0_0 = arith.constant 0 : index
    %0 = vector.load %arg1[%c0, %c0_0] : memref<16x8xf32, #tpu.memory_space<vmem>>, vector<16x8xf32>
    %c0_1 = arith.constant 0 : index
    %c0_2 = arith.constant 0 : index
    %1 = vector.load %arg2[%c0_1, %c0_2] : memref<8x192xf32, #tpu.memory_space<vmem>>, vector<8x192xf32>
    %cst = arith.constant dense<0.000000e+00> : vector<16x192xf32>
    %2 = tpu.matmul %0, %1, %cst {dimension_numbers = #tpu.dot_dimension_numbers<[1], [0], [0], [1], [0, 0, 1, 1], [], []>, precision = #tpu.contract_precision<fp32>} : vector<16x8xf32>, vector<8x192xf32>, vector<16x192xf32> -> vector<16x192xf32>
    %c0_3 = arith.constant 0 : index
    %c0_4 = arith.constant 0 : index
    %3 = vector.load %arg3[%c0_3, %c0_4] : memref<16x192xf32, #tpu.memory_space<vmem>>, vector<16x192xf32>
    tpu.vector_store %arg3[%c0_3, %c0_4], %2 {strides = array<i32>} : memref<16x192xf32, #tpu.memory_space<vmem>>, vector<16x192xf32>,
    return
  }
  func.func @transform_0(%arg0: i32) -> (i32, i32) {
    %c0_i32 = arith.constant 0 : i32
    %c0_i32_0 = arith.constant 0 : i32
    return %arg0, %c0_i32 : i32, i32
  }
  func.func @transform_1(%arg0: i32) -> (i32, i32) {
    %c0_i32 = arith.constant 0 : i32
    %c0_i32_0 = arith.constant 0 : i32
    %c0_i32_1 = arith.constant 0 : i32
    return %c0_i32, %c0_i32_0 : i32, i32
  }
  func.func @transform_2(%arg0: i32) -> (i32, i32) {
    %c0_i32 = arith.constant 0 : i32
    %c0_i32_0 = arith.constant 0 : i32
    return %arg0, %c0_i32 : i32, i32
  }
}

</mosaic_0001>

<bundles_post_ra>
// kernel: tpu_custom_call.1
= control target key start
LH: loop header
LB: loop body
LE: loop exit
PB: predicated region body
PF: predicated region fallthrough
CT: control target
= control target key end

     0   :  { %vm16_vm0 = vcmask 64512   ;;  %v606_v5 = vmov 0.0   ;;  %s649_s0 = inlined_call_operand.vmem [shape: f32[16,8], index: 0, kind: input, shape index: {}]   ;;  %s650_s1 = inlined_call_operand.vmem [shape: f32[8,192], index: 1, kind: input, shape index: {}]   ;;  %s651_s2 = inlined_call_operand.hbm [shape: f32[16,192], index: 2, kind: output, shape index: {}]  }
   0x1   :  { %v15_v0 = vld [vmem:[%s650_s1 + $0x8] sm:$0xff]  ;;  %v14_v1 = vld [vmem:[%s650_s1] sm:$0xff]  ;;  %352 = vmatprep.mubr.f32.mxu0 %v606_v5  ;;  %89 = vmatprep.mubr.f32.mxu1 %v606_v5 }
   0x2   :  { %v12_v2 = vld [vmem:[%s649_s0] sm:$0xff]  ;;  %v23_v3 = vand.u32 4294901760, %v15_v0  ;;  %v25_v4 = vand.u32 4294901760, %v14_v1  ;;  %v13_v7 = vld [vmem:[%s649_s0 + $0x8] sm:$0xff] }
   0x3   :  { %v18_v6 = vsel %vm16_vm0, %v12_v2, 0 }
   0x4   :  { %7 = vsyncpa [#allocation3], 0  ;;  %v90_v8 = vand.u32 4294901760, %v18_v6  ;;  %v21_v9 = vsel %vm16_vm0, %v13_v7, 0  ;;  %287 = vmatprep.subr.mxu0 %v23_v3  ;;  %v119_v10 = vsub.f32 %v14_v1, %v25_v4  ;;  %24 = vmatprep.subr.mxu1 %v23_v3  ;;  %v113_v11 = vsub.f32 %v15_v0, %v23_v3  ;;  %s607_s0 = smov [#allocation2]  }
   0x5   :  { %v101_v12 = vand.u32 4294901760, %v21_v9  ;;  %289 = vmatpush1.msra.mxu0 %v25_v4  ;;  %26 = vmatpush1.msra.mxu1 %v25_v4  ;;  %vm538_vm1 = vcmask 523264   ;;  %s547_s1 = sshll.u32 %s607_s0, 4  ;;  %s548_s1 = int_to_ptr.vmem [resolvable:$true] %s547_s1 }
   0x6   :  { %v91_v13 = vsub.f32 %v18_v6, %v90_v8  ;;  %v114_v14 = vand.u32 4294901760, %v113_v11  ;;  %v120_v15 = vand.u32 4294901760, %v119_v10  ;;  %s582_s17 = scalar_lea.vmem %s548_s1, 512  ;;  %p587_p1 = scmp.lt.s32.totalorder %s548_s1, %s548_s1 }
   0x7   :  { %v102_v16 = vsub.f32 %v21_v9, %v101_v12  ;;  %p583_p0 = scmp.ne.s32.totalorder %s548_s1, %s582_s17  ;;  %p588_p2 = scmp.lt.s32.totalorder %s582_s17, %s582_s17 }
   0x8   :  { %v92_v17 = vand.u32 4294901760, %v91_v13  ;;  %v115_v18 = vsub.f32 %v113_v11, %v114_v14  ;;  %374 = vmatprep.subr.mxu0 %v114_v14  ;;  %v121_v19 = vsub.f32 %v119_v10, %v120_v15 }
   0x9   :  { %v103_v20 = vand.u32 4294901760, %v102_v16  ;;  %p589_p3 = por %p588_p2, %p587_p1 }
   0xa   :  { %356 = vmatmul.mubr.f32.vlgmr.msra.gmra.mrb[0].mxu0 %v92_v17  ;;  %v93_v21 = vsub.f32 %v91_v13, %v92_v17  ;;  %v116_v22 = vand.u32 4294901760, %v115_v18  ;;  %v122_v23 = vand.u32 4294901760, %v121_v19 }
   0xb   :  { %361 = vmatprep.mubr.f32.mxu0 %v606_v5  ;;  %378 = vmatpush1.msra.mxu0 %v120_v15  ;;  %v104_v24 = vsub.f32 %v102_v16, %v103_v20  ;;  %p590_p4 = pnand %p589_p3, %p583_p0 }
   0xc   :  { %v94_v25 = vand.u32 4294901760, %v93_v21  ;;  %457 = vmatprep.subr.mxu0 %v23_v3  ;;  %117 = vmatprep.subr.mxu1 %v116_v22 }
   0xd   :  { %v105_v26 = vand.u32 4294901760, %v104_v24 }
   0xe   :  { %95 = vmatmul.mubr.f32.vlgmr.msra.gmra.mrb[0].mxu1 %v94_v25  ;;  %365 = vmatmul.mubr.f32.gmra.mrb[2].mxu0 %v103_v20 }
   0xf   :  { %123 = vmatpush1.msra.mxu1 %v122_v23  ;;  %100 = vmatprep.mubr.f32.mxu1 %v606_v5 }
  0x10   :  { %441 = vmatprep.mubr.f32.mxu0 %v606_v5  ;;  %203 = vmatprep.subr.mxu1 %v113_v11 }
  0x12   :  { %106 = vmatmul.mubr.f32.gmra.mrb[2].mxu1 %v105_v26  ;;  %443 = vmatmul.mubr.f32.vlgmr.msra.gmra.mrb[0].mxu0 %v90_v8 }
  0x13   :  { %186 = vmatprep.mubr.f32.mxu1 %v606_v5  ;;  %448 = vmatprep.mubr.f32.mxu0 %v606_v5 }
  0x14   :  { %459 = vmatpush1.msra.mxu0 %v25_v4 }
  0x16   :  { %188 = vmatmul.mubr.f32.vlgmr.msra.gmra.mrb[0].mxu1 %v90_v8  ;;  %450 = vmatmul.mubr.f32.gmra.mrb[2].mxu0 %v101_v12 }
  0x17   :  { %206 = vmatpush1.msra.mxu1 %v119_v10  ;;  %193 = vmatprep.mubr.f32.mxu1 %v606_v5 }
  0x18   :  { %522 = vmatprep.mubr.f32.mxu0 %v606_v5 }
  0x1a   :  { %195 = vmatmul.mubr.f32.gmra.mrb[2].mxu1 %v101_v12  ;;  %524 = vmatmul.mubr.f32.vlgmr.msra.gmra.mrb[0].mxu0 %v90_v8 }
  0x1b   :  { %269 = vmatprep.mubr.f32.mxu1 %v606_v5  ;;  %529 = vmatprep.mubr.f32.mxu0 %v606_v5 }
  0x1e   :  { %272 = vmatmul.mubr.f32.vlgmr.msra.gmra.mrb[0].mxu1 %v91_v13  ;;  %531 = vmatmul.mubr.f32.gmra.mrb[2].mxu0 %v101_v12 }
  0x1f   :  { %277 = vmatprep.mubr.f32.mxu1 %v606_v5 }
  0x22   :  { %280 = vmatmul.mubr.f32.gmra.mrb[2].mxu1 %v102_v16 }
  0xed   :  { %v525_v27 = vpop.f32.mrb[0].mxu0 }
  0xee   :  { %v527_v28 = vpop.f32.mrb[1].mxu0 }
  0xf1   :  { %v273_v29 = vpop.f32.mrb[0].mxu1  ;;  %v532_v30 = vpop.f32.mrb[2].mxu0 }
  0xf2   :  { %v558_v31 = vadd.f32 %v525_v27, %v273_v29  ;;  %v275_v32 = vpop.f32.mrb[1].mxu1  ;;  %v534_v33 = vpop.f32.mrb[3].mxu0 }
  0xf3   :  { %v559_v34 = vadd.f32 %v527_v28, %v275_v32 }
  0xf4   :  { %537 = vst [vmem:[#allocation2] sm:$0xff] %v558_v31 }
  0xf5   :  { %539 = vst.msk [vmem:[#allocation2 + $0x8] sm:$0xff] %vm538_vm1, %v559_v34  ;;  %v281_v35 = vpop.f32.mrb[2].mxu1 }
  0xf6   :  { %v560_v36 = vadd.f32 %v532_v30, %v281_v35  ;;  %v283_v37 = vpop.f32.mrb[3].mxu1 }
  0xf7   :  { %v561_v38 = vadd.f32 %v534_v33, %v283_v37 }
  0xf8   :  { %540 = vst [vmem:[#allocation2 + $0x10] sm:$0xff] %v560_v36 }
  0xf9   :  { %541 = vst.msk [vmem:[#allocation2 + $0x18] sm:$0xff] %vm538_vm1, %v561_v38 }
  0xfa   :  { %593 = shalt.err (!%p590_p4)
}
  0xfb   :  { %s594_s20 = scalar_lea.hbm %s651_s2, 512 }
  0xfc   :  { %p595_p5 = scmp.ne.s32.totalorder %s651_s2, %s594_s20  ;;  %p598_p6 = scmp.lt.u32.totalorder %s594_s20, %s651_s2 }
  0xfe   :  { %p600_p7 = pnand %p598_p6, %p595_p5 }
 0x100   :  { %603 = shalt.err (!%p600_p7)
}
 0x101   :  { %s608_s25 = smov 256   ;;  %s609_s26 = smov 16  }
 0x102   :  { %553 = dma.vmem_to_hbm [thread:$0]  %s548_s1, 512, %s651_s2, [#allocation3], %s608_s25, %s608_s25, %s609_s26  }
 0x103   :  { %604 = dma.done.wait [#allocation3], 512  }
 0x104   :  { %605 = vsyncadd [#allocation3], 4294966784 }
 0x105   :  { %557 = vsyncpa [#allocation3], 1 }

</bundles_post_ra>
